<compile_context>
chip_gen: v7x
topology: tpu7x:2x2x1
jax: 0.10.0
libtpu: 0.0.40
codegen_flags: <defaults>
</compile_context>

<pallas_src>
import functools
import math

import jax
import jax.numpy as jnp
from jax.experimental import pallas as pl
from jax.experimental.pallas import tpu as pltpu

_INV_LN2 = 1.0 / math.log(2.0)


def _round_up(x, m):
    return -(-x // m) * m


def _round_down(x, m):
    return (x // m) * m


def _sublane_multiple(dtype):
    """Sublane packing multiple: f32 -> 8, bf16/f16 -> 16, 8-bit -> 32."""
    itemsize = jnp.dtype(dtype).itemsize
    return max(8, 32 // max(int(itemsize), 1))


@functools.lru_cache(maxsize=1)
def _tpu_params():
    """Returns (block_budget_bytes, vmem_limit_bytes, multi_tensorcore)."""
    vmem_cap = None
    try:
        info = pltpu.get_tpu_info()
        cap = getattr(info, "vmem_capacity_bytes", None)
        if cap:
            vmem_cap = int(cap)
    except Exception:
        vmem_cap = None

    kind = ""
    try:
        kind = jax.devices()[0].device_kind.lower()
    except Exception:
        kind = ""
    multi_tc = "v7" in kind  # v7x: 2 TensorCores share the chip's VMEM/HBM.

    if vmem_cap is None:
        if "v7" in kind:
            vmem_cap = 64 * 1024 * 1024
        elif ("v5" in kind) or ("v6" in kind):
            vmem_cap = 128 * 1024 * 1024
        else:
            vmem_cap = 64 * 1024 * 1024  # conservative default

    mib = 1024 * 1024
    if vmem_cap >= 128 * mib:
        # v5e / v6e: 128 MiB physical VMEM -> big blocks, generous limit.
        return 8 * mib, 64 * mib, multi_tc
    if vmem_cap >= 64 * mib:
        # v7x: 64 MiB physical VMEM -> ~6 MiB blocks, keep total under ~48 MiB
        # (2*in + 2*out double buffers + ~3 f32 temps ~= 7 blocks ~= 42 MiB).
        return 6 * mib, 48 * mib, multi_tc
    return 2 * mib, 32 * mib, multi_tc


def _pick_tile(extent, max_tile, mult, force_split):
    """Pick a block size along one parallel axis.

    Returns either the full `extent` (always a legal block dim) or a multiple
    of `mult`.  When `force_split` (multi-TensorCore chips) prefer an even,
    balanced number of blocks so both cores get equal work.
    """
    max_tile = max(mult, _round_down(max(max_tile, mult), mult))
    if extent <= max_tile:
        if force_split and extent > mult:
            t = _round_up(pl.cdiv(extent, 2), mult)
            if t < extent:
                return t
        return extent
    nblk = pl.cdiv(extent, max_tile)
    if force_split and nblk % 2 == 1:
        nblk += 1
    t = min(max_tile, _round_up(pl.cdiv(extent, nblk), mult))
    return max(t, mult)


def _softmax_kernel(x_ref, o_ref, *, axis):
    # One block holds the full reduction extent along `axis`.
    x = x_ref[...].astype(jnp.float32)
    max_x = jnp.max(x, axis=axis, keepdims=True)
    exp_act = jnp.exp2((x - max_x) * _INV_LN2)              # EUP transcendental
    exp_sum = jnp.sum(exp_act, axis=axis, keepdims=True)
    # EUP approximate reciprocal (free slot alongside exp2) + one Newton step
    # on the tiny reduced slab to restore ~f32 accuracy of the normalizer.
    inv = pl.reciprocal(exp_sum, approx=True)
    inv = inv * (2.0 - exp_sum * inv)
    o_ref[...] = (exp_act * inv).astype(o_ref.dtype)


def _softmax_last_axis(x2d, block_budget, vmem_limit, multi_tc):
    """Softmax over the last axis of a (rows, C) array (lane reduce)."""
    rows, c = x2d.shape
    sub = _sublane_multiple(x2d.dtype)
    # Padding-aware budget: the lane (minor) dim lives padded to 128 in VMEM,
    # and the kernel's f32 temporaries dominate -> budget in f32-equiv bytes.
    c_pad = _round_up(max(c, 1), 128)
    budget_rows = max(sub, _round_down(max(block_budget // (4 * c_pad), sub), sub))
    tile_rows = _pick_tile(rows, budget_rows, sub, multi_tc)
    grid = (pl.cdiv(rows, tile_rows),)

    total = rows * c
    cost = pl.CostEstimate(
        flops=5 * total,
        transcendentals=total,
        bytes_accessed=2 * total * x2d.dtype.itemsize,
    )
    return pl.pallas_call(
        functools.partial(_softmax_kernel, axis=-1),
        out_shape=jax.ShapeDtypeStruct((rows, c), x2d.dtype),
        grid_spec=pltpu.PrefetchScalarGridSpec(
            num_scalar_prefetch=0,
            grid=grid,
            in_specs=[pl.BlockSpec((tile_rows, c), lambda i: (i, 0))],
            out_specs=pl.BlockSpec((tile_rows, c), lambda i: (i, 0)),
        ),
        compiler_params=pltpu.CompilerParams(
            dimension_semantics=("parallel",),
            vmem_limit_bytes=vmem_limit,
        ),
        cost_estimate=cost,
    )(x2d)


def _softmax_middle_axis(x3d, block_budget, vmem_limit, multi_tc):
    """Softmax over the middle axis of a (L, C, R) array (sublane reduce)."""
    l, c, r = x3d.shape
    # Sublane (second-minor) dim is C (the reduce dim, padded to >=8 for f32
    # temps); lane dim is the big flattened trailing extent (padded to 128).
    c_pad = _round_up(max(c, 1), 8)
    lane_budget = max(128, _round_down(max(block_budget // (4 * c_pad), 128), 128))
    tile_r = _pick_tile(r, lane_budget, 128, False)
    r_pad = _round_up(tile_r, 128)
    row_budget = max(1, block_budget // (4 * c_pad * r_pad))
    # Only force a >=2 split on the outer axis when the lane axis doesn't
    # already provide multiple blocks (and only on multi-TC chips).
    force_l = multi_tc and (pl.cdiv(r, tile_r) < 2)
    tile_l = _pick_tile(l, row_budget, 1, force_l)
    grid = (pl.cdiv(l, tile_l), pl.cdiv(r, tile_r))

    total = l * c * r
    cost = pl.CostEstimate(
        flops=5 * total,
        transcendentals=total,
        bytes_accessed=2 * total * x3d.dtype.itemsize,
    )
    return pl.pallas_call(
        functools.partial(_softmax_kernel, axis=1),
        out_shape=jax.ShapeDtypeStruct((l, c, r), x3d.dtype),
        grid_spec=pltpu.PrefetchScalarGridSpec(
            num_scalar_prefetch=0,
            grid=grid,
            in_specs=[pl.BlockSpec((tile_l, c, tile_r), lambda i, j: (i, 0, j))],
            out_specs=pl.BlockSpec((tile_l, c, tile_r), lambda i, j: (i, 0, j)),
        ),
        compiler_params=pltpu.CompilerParams(
            dimension_semantics=("parallel", "parallel"),
            vmem_limit_bytes=vmem_limit,
        ),
        cost_estimate=cost,
    )(x3d)


def my_softmax(x, dim):
    """Pallas equivalent of MySoftmax(dim).forward(x)."""
    ndim = x.ndim
    dim = dim % ndim
    shape = x.shape
    c = shape[dim]
    lead = 1
    for s in shape[:dim]:
        lead *= s
    trail = 1
    for s in shape[dim + 1:]:
        trail *= s

    block_budget, vmem_limit, multi_tc = _tpu_params()

    if trail == 1:
        # Softmax dim is (effectively) last: reduce along lanes.
        # NOTE: for C < 128 this path is lane-sparse (masked partial stores);
        # HBM-side blocks are still contiguous so it stays 2-pass.
        # TODO(synk): re-layout small-C last-dim softmax to a lane-dense form.
        out = _softmax_last_axis(x.reshape(lead, c), block_budget, vmem_limit,
                                 multi_tc)
    else:
        # Softmax dim is interior: reduce along sublanes, lanes = trailing dims.
        out = _softmax_middle_axis(x.reshape(lead, c, trail), block_budget,
                                   vmem_limit, multi_tc)
    return out.reshape(shape)


if __name__ == "__main__":
    key = jax.random.PRNGKey(0)
    # NCHW input, softmax over the channel dim (dim=1), like the test harness.
    x = jax.random.normal(key, (2, 4, 16, 16), dtype=jnp.float32)

    out = jax.block_until_ready(my_softmax(x, 1))
    assert out.shape == x.shape and out.dtype == x.dtype
    ref = jax.nn.softmax(x, axis=1)
    assert jnp.allclose(out, ref, atol=1e-4, rtol=1e-4), "mismatch vs reference (dim=1)"

    # Also exercise the last-axis (lane-reduce) code path.
    out_last = jax.block_until_ready(my_softmax(x, -1))
    ref_last = jax.nn.softmax(x, axis=-1)
    assert jnp.allclose(out_last, ref_last, atol=1e-4, rtol=1e-4), "mismatch vs reference (dim=-1)"

    print("KERNEL_OK")
</pallas_src>

<mosaic_0001>
module attributes {stable_mosaic.version = 11 : i64} {
  func.func @_softmax_kernel(%arg0: i32, %arg1: i32, %arg2: memref<2x4x256xf32, #tpu.memory_space<vmem>>, %arg3: memref<2x4x256xf32, #tpu.memory_space<vmem>>) attributes {dimension_semantics = [#tpu.dimension_semantics<parallel>, #tpu.dimension_semantics<parallel>], iteration_bounds = array<i64: 1, 1>, scalar_prefetch = 0 : i64, scratch_operands = 0 : i64, tpu.core_type = #tpu.core_type<tc>, window_params = [{transform_indices = @transform_0, window_bounds = array<i64: 2, 4, 256>}, {transform_indices = @transform_1, window_bounds = array<i64: 2, 4, 256>}]} {
    %c0 = arith.constant 0 : index
    %c0_0 = arith.constant 0 : index
    %c0_1 = arith.constant 0 : index
    %0 = vector.load %arg2[%c0, %c0_0, %c0_1] : memref<2x4x256xf32, #tpu.memory_space<vmem>>, vector<2x4x256xf32>
    %cst = arith.constant dense<0xFF800000> : vector<2x256xf32>
    %1 = vector.multi_reduction <maximumf>, %0, %cst [1] : vector<2x4x256xf32> to vector<2x256xf32>
    %2 = vector.shape_cast %1 : vector<2x256xf32> to vector<2x1x256xf32>
    %3 = vector.broadcast %2 : vector<2x1x256xf32> to vector<2x4x256xf32>
    %4 = arith.subf %0, %3 : vector<2x4x256xf32>
    %cst_2 = arith.constant 1.44269502 : f32
    %5 = vector.broadcast %cst_2 : f32 to vector<2x4x256xf32>
    %6 = arith.mulf %4, %5 : vector<2x4x256xf32>
    %7 = math.exp2 %6 : vector<2x4x256xf32>
    %cst_3 = arith.constant dense<0.000000e+00> : vector<2x256xf32>
    %8 = vector.multi_reduction <add>, %7, %cst_3 [1] : vector<2x4x256xf32> to vector<2x256xf32>
    %9 = vector.shape_cast %8 : vector<2x256xf32> to vector<2x1x256xf32>
    %10 = tpu.reciprocal %9 {approx = true} : vector<2x1x256xf32> -> vector<2x1x256xf32>
    %11 = arith.mulf %9, %10 : vector<2x1x256xf32>
    %cst_4 = arith.constant 2.000000e+00 : f32
    %12 = vector.broadcast %cst_4 : f32 to vector<2x1x256xf32>
    %13 = arith.subf %12, %11 : vector<2x1x256xf32>
    %14 = arith.mulf %10, %13 : vector<2x1x256xf32>
    %15 = vector.broadcast %14 : vector<2x1x256xf32> to vector<2x4x256xf32>
    %16 = arith.mulf %7, %15 : vector<2x4x256xf32>
    %c0_5 = arith.constant 0 : index
    %c0_6 = arith.constant 0 : index
    %c0_7 = arith.constant 0 : index
    %17 = vector.load %arg3[%c0_5, %c0_6, %c0_7] : memref<2x4x256xf32, #tpu.memory_space<vmem>>, vector<2x4x256xf32>
    tpu.vector_store %arg3[%c0_5, %c0_6, %c0_7], %16 {strides = array<i32>} : memref<2x4x256xf32, #tpu.memory_space<vmem>>, vector<2x4x256xf32>,
    return
  }
  func.func @transform_0(%arg0: i32, %arg1: i32) -> (i32, i32, i32) {
    %c0_i32 = arith.constant 0 : i32
    %c0_i32_0 = arith.constant 0 : i32
    return %arg0, %c0_i32, %arg1 : i32, i32, i32
  }
  func.func @transform_1(%arg0: i32, %arg1: i32) -> (i32, i32, i32) {
    %c0_i32 = arith.constant 0 : i32
    %c0_i32_0 = arith.constant 0 : i32
    return %arg0, %c0_i32, %arg1 : i32, i32, i32
  }
}

</mosaic_0001>

<bundles_post_ra>
// kernel: tpu_custom_call.1
= control target key start
LH: loop header
LB: loop body
LE: loop exit
PB: predicated region body
PF: predicated region fallthrough
CT: control target
= control target key end

     0   :  { %6 = vsyncpa [#allocation3], 0  ;;  %s271_s0 = inlined_call_operand.hbm [shape: f32[2,4,256], index: 0, kind: input, shape index: {}]   ;;  %s272_s1 = inlined_call_operand.hbm [shape: f32[2,4,256], index: 1, kind: output, shape index: {}]  }
   0x1   :  { %7 = vsyncpa [#allocation4], 0  ;;  %s219_s6 = smov [#allocation2]   ;;  %s171_s10 = scalar_lea.hbm %s271_s0, 256 }
   0x2   :  { %s13_s7 = sshll.u32 %s219_s6, 4  ;;  %p172_p0 = scmp.ne.s32.totalorder %s271_s0, %s171_s10  ;;  %s14_s7 = int_to_ptr.vmem [resolvable:$true] %s13_s7 }
   0x3   :  { %p175_p1 = scmp.lt.u32.totalorder %s171_s10, %s271_s0 }
   0x5   :  { %p177_p2 = pnand %p175_p1, %p172_p0 }
   0x7   :  { %180 = shalt.err (!%p177_p2)
}
   0x8   :  { %s181_s15 = scalar_lea.vmem %s14_s7, 256  ;;  %p186_p4 = scmp.lt.s32.totalorder %s14_s7, %s14_s7 }
   0x9   :  { %p182_p3 = scmp.ne.s32.totalorder %s14_s7, %s181_s15  ;;  %p187_p5 = scmp.lt.s32.totalorder %s181_s15, %s181_s15 }
   0xb   :  { %p188_p6 = por %p187_p5, %p186_p4 }
   0xd   :  { %p189_p7 = pnand %p188_p6, %p182_p3 }
   0xf   :  { %192 = shalt.err (!%p189_p7)
}
  0x10   :  { %s220_s16 = smov 128   ;;  %s221_s17 = smov 8  }
  0x11   :  { %19 = dma.hbm_to_vmem [thread:$0]  %s271_s0, 256, %s14_s7, [#allocation3], %s220_s16, %s220_s16, %s221_s17  }
  0x12   :  { %215 = dma.done.wait [#allocation3], 256  }
  0x13   :  { %216 = vsyncadd [#allocation3], 4294967040  ;;  %vm31_vm0 = vcmask 1043456   ;;  %v23_v0 = vld [vmem:[#allocation2] sm:$0xff]  ;;  %v24_v1 = vld [vmem:[#allocation2 + $0x8] sm:$0xff]  ;;  %s222_s0 = smov [#allocation5]  }
  0x14   :  { %v27_v2 = vcombine.high %v23_v0, %v23_v0  ;;  %v32_v3 = vsel %vm31_vm0, %v23_v0, -inf  ;;  %v28_v4 = vcombine.high %v24_v1, %v24_v1  ;;  %v46_v5 = vsel %vm31_vm0, %v24_v1, -inf  ;;  %s141_s20 = sshll.u32 %s222_s0, 4  ;;  %s142_s20 = int_to_ptr.vmem [resolvable:$true] %s141_s20 }
  0x15   :  { %v33_v6 = vrot.slane %v32_v3, 4  ;;  %v47_v7 = vrot.slane %v46_v5, 4  ;;  %s193_s21 = scalar_lea.vmem %s142_s20, 256  ;;  %p198_p9 = scmp.lt.s32.totalorder %s142_s20, %s142_s20 }
  0x16   :  { %v39_v8 = vsel %vm31_vm0, %v27_v2, -inf  ;;  %v53_v9 = vsel %vm31_vm0, %v28_v4, -inf  ;;  %p194_p8 = scmp.ne.s32.totalorder %s142_s20, %s193_s21  ;;  %p199_p10 = scmp.lt.s32.totalorder %s193_s21, %s193_s21 }
  0x17   :  { %v34_v10 = vmax.f32 %v32_v3, %v33_v6  ;;  %v40_v11 = vrot.slane %v39_v8, 4  ;;  %v48_v12 = vmax.f32 %v46_v5, %v47_v7  ;;  %v54_v13 = vrot.slane %v53_v9, 4 }
  0x18   :  { %p200_p11 = por %p199_p10, %p198_p9 }
  0x19   :  { %v35_v14 = vrot.slane %v34_v10, 2  ;;  %v41_v15 = vmax.f32 %v39_v8, %v40_v11  ;;  %v49_v16 = vrot.slane %v48_v12, 2  ;;  %v55_v17 = vmax.f32 %v53_v9, %v54_v13 }
  0x1a   :  { %p201_p12 = pnand %p200_p11, %p194_p8 }
  0x1b   :  { %v36_v18 = vmax.f32 %v34_v10, %v35_v14  ;;  %v42_v19 = vrot.slane %v41_v15, 2  ;;  %v50_v20 = vmax.f32 %v48_v12, %v49_v16  ;;  %v56_v21 = vrot.slane %v55_v17, 2 }
  0x1d   :  { %v37_v22 = vrot.slane %v36_v18, 1  ;;  %v43_v23 = vmax.f32 %v41_v15, %v42_v19  ;;  %v51_v24 = vrot.slane %v50_v20, 1  ;;  %v57_v25 = vmax.f32 %v55_v17, %v56_v21 }
  0x1f   :  { %v38_v26 = vmax.f32 %v36_v18, %v37_v22  ;;  %v44_v27 = vrot.slane %v43_v23, 1  ;;  %v52_v28 = vmax.f32 %v50_v20, %v51_v24  ;;  %v58_v29 = vrot.slane %v57_v25, 1 }
  0x21   :  { %v45_v30 = vmax.f32 %v43_v23, %v44_v27  ;;  %v59_v31 = vmax.f32 %v57_v25, %v58_v29 }
  0x23   :  { %v64_v32 = vcombine.low %v38_v26, %v45_v30  ;;  %v65_v33 = vcombine.low %v52_v28, %v59_v31 }
  0x25   :  { %v68_v34 = vsub.f32 %v23_v0, %v64_v32  ;;  %v69_v35 = vsub.f32 %v24_v1, %v65_v33 }
  0x27   :  { %v70_v36 = vmul.f32 1.442695, %v68_v34  ;;  %v71_v37 = vmul.f32 1.442695, %v69_v35 }
  0x29   :  { %159 = vpow2.f32 %v70_v36 }
  0x2a   :  { %161 = vpow2.f32 %v71_v37 }
  0x33   :  { %v160_v38 = vpop.eup %159 }
  0x34   :  { %v162_v39 = vpop.eup %161  ;;  %v76_v40 = vcombine.high %v160_v38, %v160_v38  ;;  %v80_v41 = vsel %vm31_vm0, %v160_v38, 0.0 }
  0x35   :  { %v81_v42 = vrot.slane %v80_v41, 4  ;;  %v77_v43 = vcombine.high %v162_v39, %v162_v39  ;;  %v94_v44 = vsel %vm31_vm0, %v162_v39, 0.0 }
  0x36   :  { %v87_v45 = vsel %vm31_vm0, %v76_v40, 0.0  ;;  %v95_v46 = vrot.slane %v94_v44, 4 }
  0x37   :  { %v82_v47 = vadd.f32 %v81_v42, %v80_v41  ;;  %v88_v48 = vrot.slane %v87_v45, 4  ;;  %v101_v49 = vsel %vm31_vm0, %v77_v43, 0.0 }
  0x38   :  { %v96_v50 = vadd.f32 %v95_v46, %v94_v44  ;;  %v102_v51 = vrot.slane %v101_v49, 4 }
  0x39   :  { %v83_v52 = vrot.slane %v82_v47, 2  ;;  %v89_v53 = vadd.f32 %v88_v48, %v87_v45 }
  0x3a   :  { %v97_v54 = vrot.slane %v96_v50, 2  ;;  %v103_v55 = vadd.f32 %v102_v51, %v101_v49 }
  0x3b   :  { %v84_v56 = vadd.f32 %v83_v52, %v82_v47  ;;  %v90_v57 = vrot.slane %v89_v53, 2 }
  0x3c   :  { %v98_v58 = vadd.f32 %v97_v54, %v96_v50  ;;  %v104_v59 = vrot.slane %v103_v55, 2 }
  0x3d   :  { %v85_v60 = vrot.slane %v84_v56, 1  ;;  %v91_v61 = vadd.f32 %v90_v57, %v89_v53 }
  0x3e   :  { %v99_v62 = vrot.slane %v98_v58, 1  ;;  %v105_v63 = vadd.f32 %v104_v59, %v103_v55 }
  0x3f   :  { %v86_v0 = vadd.f32 %v85_v60, %v84_v56  ;;  %v92_v1 = vrot.slane %v91_v61, 1 }
  0x40   :  { %v100_v2 = vadd.f32 %v99_v62, %v98_v58  ;;  %v106_v3 = vrot.slane %v105_v63, 1 }
  0x41   :  { %v93_v4 = vadd.f32 %v92_v1, %v91_v61  ;;  %163 = vrcp.f32 %v86_v0 }
  0x42   :  { %v107_v5 = vadd.f32 %v106_v3, %v105_v63  ;;  %165 = vrcp.f32 %v100_v2 }
  0x43   :  { %167 = vrcp.f32 %v93_v4 }
  0x44   :  { %169 = vrcp.f32 %v107_v5 }
  0x4b   :  { %v164_v6 = vpop.eup %163 }
  0x4c   :  { %v166_v7 = vpop.eup %165  ;;  %v112_v8 = vmul.f32 %v164_v6, %v86_v0 }
  0x4d   :  { %v168_v9 = vpop.eup %167  ;;  %v114_v10 = vmul.f32 %v166_v7, %v100_v2 }
  0x4e   :  { %v170_v11 = vpop.eup %169  ;;  %v113_v12 = vmul.f32 %v168_v9, %v93_v4  ;;  %v116_v13 = vsub.f32 2.0, %v112_v8 }
  0x4f   :  { %v115_v14 = vmul.f32 %v170_v11, %v107_v5  ;;  %v118_v15 = vsub.f32 2.0, %v114_v10 }
  0x50   :  { %v117_v16 = vsub.f32 2.0, %v113_v12  ;;  %v120_v17 = vmul.f32 %v164_v6, %v116_v13 }
  0x51   :  { %v119_v18 = vsub.f32 2.0, %v115_v14  ;;  %v122_v19 = vmul.f32 %v166_v7, %v118_v15 }
  0x52   :  { %v121_v20 = vmul.f32 %v168_v9, %v117_v16 }
  0x53   :  { %v123_v21 = vmul.f32 %v170_v11, %v119_v18 }
  0x54   :  { %v128_v22 = vcombine.low %v120_v17, %v121_v20 }
  0x55   :  { %v129_v23 = vcombine.low %v122_v19, %v123_v21 }
  0x56   :  { %v132_v24 = vmul.f32 %v160_v38, %v128_v22 }
  0x57   :  { %v133_v25 = vmul.f32 %v162_v39, %v129_v23 }
  0x58   :  { %134 = vst [vmem:[#allocation5] sm:$0xff] %v132_v24 }
  0x59   :  { %135 = vst [vmem:[#allocation5 + $0x8] sm:$0xff] %v133_v25 }
  0x5a   :  { %204 = shalt.err (!%p201_p12)
}
  0x5b   :  { %s205_s24 = scalar_lea.hbm %s272_s1, 256 }
  0x5c   :  { %p206_p13 = scmp.ne.s32.totalorder %s272_s1, %s205_s24  ;;  %p209_p0 = scmp.lt.u32.totalorder %s205_s24, %s272_s1 }
  0x5e   :  { %p211_p1 = pnand %p209_p0, %p206_p13 }
  0x60   :  { %214 = shalt.err (!%p211_p1)
}
  0x61   :  { %147 = dma.vmem_to_hbm [thread:$0]  %s142_s20, 256, %s272_s1, [#allocation4], %s220_s16, %s220_s16, %s221_s17  }
  0x62   :  { %217 = dma.done.wait [#allocation4], 256  }
  0x63   :  { %218 = vsyncadd [#allocation4], 4294967040 }
  0x64   :  { %151 = vsyncpa [#allocation3], 1 }
  0x65   :  { %152 = vsyncpa [#allocation4], 1 }

</bundles_post_ra>
